<compile_context>
chip_gen: v6e
topology: v6e:2x2x1
jax: 0.10.0
libtpu: 0.0.40
codegen_flags: <defaults>
</compile_context>

<pallas_src>
import jax
import jax.numpy as jnp
from jax.experimental import pallas as pl
from jax.experimental.pallas import tpu as pltpu


_C = 0.7978845608028654          # sqrt(2/pi) -> matches torch GELU(approximate='tanh')
_CG = _C * 0.044715              # folded constant: sqrt(2/pi) * 0.044715


def _ffn_kernel(x_ref, w1_ref, b1_ref, w2_ref, b2_ref, o_ref, acc_ref, xbf_ref):
    # x:   (tm, dim)         native dtype (block resident across k)
    # w1:  (dim, tk)         bf16 chunk of first Linear weight (streamed over k)
    # b1:  (1, tk)           f32 chunk of first bias (streamed over k)
    # w2:  (tk, dim_out_p)   bf16 chunk of projection weight (streamed over k)
    # b2:  (1, dim_out_p)    f32, resident (single-buffered)
    # o:   (tm, dim_out_p)   written once on the last k step
    # acc: (tm, dim_out_p)   f32 scratch accumulator
    # xbf: (tm, dim)         bf16 scratch (x cast once per token tile)
    k = pl.program_id(1)

    @pl.when(k == 0)
    def _():
        acc_ref[...] = jnp.zeros_like(acc_ref)
        xbf_ref[...] = x_ref[...].astype(jnp.bfloat16)

    # First Linear chunk: bf16 MXU matmul, f32 accumulation, f32 bias add.
    h = jnp.dot(xbf_ref[...], w1_ref[...], preferred_element_type=jnp.float32)
    h = h + b1_ref[...]

    # tanh-approximate GELU with folded constants (tanh runs on the EUP slot).
    h2 = h * h
    t = jnp.tanh(h * (_C + _CG * h2))
    g = h * (0.5 + 0.5 * t)

    # Dropout(p=0.0) -> identity (inference semantics).
    # Second Linear chunk: accumulate (tm, tk) @ (tk, dim_out_p) into the f32 scratch.
    acc_ref[...] += jnp.dot(g.astype(w2_ref.dtype), w2_ref[...],
                            preferred_element_type=jnp.float32)

    @pl.when(k == pl.num_programs(1) - 1)
    def _():
        o_ref[...] = (acc_ref[...] + b2_ref[...]).astype(o_ref.dtype)


def _round_up(x, m):
    return ((x + m - 1) // m) * m


def _vmem_capacity_bytes():
    try:
        return int(pltpu.get_tpu_info().vmem_capacity_bytes)
    except Exception:
        return 64 * 1024 * 1024   # conservative fallback = v7x per-TC VMEM


def _per_step_vmem(tm, dim, tk, dim_out_p, x_itemsize, out_itemsize):
    """Generous per-grid-step VMEM estimate (counts the live GELU temporaries)."""
    return (2 * tm * dim * x_itemsize            # x tile (double-buffered across token tiles)
            + tm * dim * 2                       # bf16 x scratch
            + 2 * dim * tk * 2                   # w1 chunk (bf16, double-buffered)
            + 2 * tk * 4                         # b1 chunk (f32, double-buffered)
            + 2 * tk * dim_out_p * 2             # w2 chunk (bf16, double-buffered)
            + dim_out_p * 4                      # b2 (resident, single-buffered)
            + 2 * tm * dim_out_p * out_itemsize  # output tile (double-buffered)
            + tm * dim_out_p * 4                 # acc scratch (f32)
            + 4 * tm * tk * 4)                   # h / h2 / t / g live f32 temporaries


def feed_forward(x, w1, b1, w2, b2, *, tm=512, tk=512):
    """FeedForward forward pass.

    x : (..., dim)         any float dtype; output keeps x.dtype
    w1: (dim, inner)       first Linear weight, stored [in, out]
    b1: (inner,)           first Linear bias
    w2: (inner, dim_out)   projection weight, stored [in, out]
    b2: (dim_out,)         projection bias
    """
    dim = x.shape[-1]
    inner = w1.shape[1]
    dim_out = w2.shape[1]
    lead = x.shape[:-1]
    n_tok = 1
    for s in lead:
        n_tok *= s

    out_dtype = x.dtype
    x_itemsize = jnp.dtype(x.dtype).itemsize
    out_itemsize = jnp.dtype(out_dtype).itemsize

    # MXU / lane-friendly padded dims.  Only weights & biases are padded (zero rows/cols do
    # not change the result); the output pad is sliced off below.  In a real model these
    # casts/pads would be done once at parameter-load time, not per call.
    dim_out_p = _round_up(dim_out, 128)
    inner_128 = _round_up(inner, 128)
    tk_eff = _round_up(min(tk, inner_128), 128)
    inner_p = _round_up(inner_128, tk_eff)

    vmem_cap = _vmem_capacity_bytes()

    # Token tile: multiple of 128 whenever n_tok >= 128; sized against the actual per-TC
    # VMEM so v7x (64 MiB) drops to a smaller tile while v5e/v6e (128 MiB) keep the big one.
    if n_tok < 128:
        tm_eff = max(8, _round_up(n_tok, 8))
    else:
        budget = int(0.6 * vmem_cap)
        tm_eff = max(128, _round_up(tm, 128))
        tm_eff = min(tm_eff, _round_up(n_tok, 128))
        while (tm_eff > 128 and
               _per_step_vmem(tm_eff, dim, tk_eff, dim_out_p,
                              x_itemsize, out_itemsize) > budget):
            tm_eff = max(128, _round_up(tm_eff // 2, 128))

    # bf16 MXU weights (f32 accumulation in-kernel); f32 biases; zero-pad to tiled dims.
    w1_bf = w1.astype(jnp.bfloat16)
    w2_bf = w2.astype(jnp.bfloat16)
    b1_f = b1.astype(jnp.float32).reshape(1, inner)
    b2_f = b2.astype(jnp.float32).reshape(1, dim_out)
    if inner_p != inner:
        w1_bf = jnp.pad(w1_bf, ((0, 0), (0, inner_p - inner)))
        b1_f = jnp.pad(b1_f, ((0, 0), (0, inner_p - inner)))
        w2_bf = jnp.pad(w2_bf, ((0, inner_p - inner), (0, 0)))
    if dim_out_p != dim_out:
        w2_bf = jnp.pad(w2_bf, ((0, 0), (0, dim_out_p - dim_out)))
        b2_f = jnp.pad(b2_f, ((0, 0), (0, dim_out_p - dim_out)))

    x2d = x.reshape(n_tok, dim)

    grid = (pl.cdiv(n_tok, tm_eff), inner_p // tk_eff)

    need = _per_step_vmem(tm_eff, dim, tk_eff, dim_out_p, x_itemsize, out_itemsize)
    vmem_limit = int(min(max(2 * need, 32 * 1024 * 1024), int(0.9 * vmem_cap)))

    flops = 2 * n_tok * dim * inner + 2 * n_tok * inner * dim_out
    bytes_accessed = (n_tok * dim * x_itemsize
                      + n_tok * dim_out_p * out_itemsize
                      + (dim * inner_p + inner_p * dim_out_p) * 2
                      + (inner_p + dim_out_p) * 4)
    cost = pl.CostEstimate(flops=int(flops),
                           transcendentals=int(n_tok * inner),
                           bytes_accessed=int(bytes_accessed))

    out = pl.pallas_call(
        _ffn_kernel,
        out_shape=jax.ShapeDtypeStruct((n_tok, dim_out_p), out_dtype),
        grid_spec=pltpu.PrefetchScalarGridSpec(
            num_scalar_prefetch=0,
            grid=grid,
            in_specs=[
                pl.BlockSpec((tm_eff, dim), lambda i, k: (i, 0)),
                pl.BlockSpec((dim, tk_eff), lambda i, k: (0, k)),
                pl.BlockSpec((1, tk_eff), lambda i, k: (0, k)),
                pl.BlockSpec((tk_eff, dim_out_p), lambda i, k: (k, 0)),
                pl.BlockSpec((1, dim_out_p), lambda i, k: (0, 0),
                             pipeline_mode=pl.Buffered(1)),   # constant -> single-buffer
            ],
            out_specs=pl.BlockSpec((tm_eff, dim_out_p), lambda i, k: (i, 0)),
            scratch_shapes=[
                pltpu.VMEM((tm_eff, dim_out_p), jnp.float32),   # acc
                pltpu.VMEM((tm_eff, dim), jnp.bfloat16),        # x cast once per token tile
            ],
        ),
        compiler_params=pltpu.CompilerParams(
            # TODO(synk): on v7x, CORE_PARALLEL (or an explicit pl.core_map over the 2 TCs)
            # on the token axis would shard across TensorCores; plain "parallel" is kept
            # here for portability across v5e/v6e/v7x.
            dimension_semantics=("parallel", "arbitrary"),
            vmem_limit_bytes=vmem_limit,
        ),
        cost_estimate=cost,
    )(x2d, w1_bf, b1_f, w2_bf, b2_f)

    if dim_out_p != dim_out:
        out = out[:, :dim_out]
    return out.reshape(*lead, dim_out)


if __name__ == "__main__":
    # Module config: dim=32, mult=4 -> inner_dim=128, dim_out=dim=32, bias=True,
    # activation_fn='gelu-approximate', dropout=0.0 (identity).
    dim = 32
    mult = 4
    inner_dim = dim * mult
    dim_out = dim
    batch, seq = 2, 8

    key = jax.random.PRNGKey(0)
    k_x, k_w1, k_b1, k_w2, k_b2 = jax.random.split(key, 5)

    x = jax.random.normal(k_x, (batch, seq, dim), dtype=jnp.float32)
    # Deterministic synthetic parameters (roughly Linear-init scale).
    w1 = jax.random.normal(k_w1, (dim, inner_dim), dtype=jnp.float32) * (1.0 / jnp.sqrt(dim))
    b1 = jax.random.normal(k_b1, (inner_dim,), dtype=jnp.float32) * 0.01
    w2 = jax.random.normal(k_w2, (inner_dim, dim_out), dtype=jnp.float32) * (1.0 / jnp.sqrt(inner_dim))
    b2 = jax.random.normal(k_b2, (dim_out,), dtype=jnp.float32) * 0.01

    out = feed_forward(x, w1, b1, w2, b2)
    out = jax.block_until_ready(out)

    # Full-precision reference in plain JAX (same math as the PyTorch module).
    h_ref = x.reshape(-1, dim) @ w1 + b1
    c = jnp.sqrt(2.0 / jnp.pi)
    g_ref = 0.5 * h_ref * (1.0 + jnp.tanh(c * (h_ref + 0.044715 * h_ref ** 3)))
    o_ref = (g_ref @ w2 + b2).reshape(batch, seq, dim_out)

    # bf16 MXU inputs + f32 accumulation -> looser tolerance than pure f32.
    assert out.shape == o_ref.shape and out.dtype == o_ref.dtype
    max_abs = jnp.max(jnp.abs(out - o_ref))
    assert jnp.allclose(out, o_ref, atol=3e-2, rtol=3e-2), f"mismatch vs reference (max abs diff {max_abs})"

    print("KERNEL_OK")
</pallas_src>

<mosaic_0001>
module attributes {stable_mosaic.version = 11 : i64} {
  func.func @_ffn_kernel(%arg0: i32, %arg1: i32, %arg2: memref<16x32xf32, #tpu.memory_space<vmem>>, %arg3: memref<32x128xbf16, #tpu.memory_space<vmem>>, %arg4: memref<1x128xf32, #tpu.memory_space<vmem>>, %arg5: memref<128x128xbf16, #tpu.memory_space<vmem>>, %arg6: memref<1x128xf32, #tpu.memory_space<vmem>>, %arg7: memref<16x128xf32, #tpu.memory_space<vmem>>, %arg8: memref<16x128xf32, #tpu.memory_space<vmem>>, %arg9: memref<16x32xbf16, #tpu.memory_space<vmem>>) attributes {dimension_semantics = [#tpu.dimension_semantics<parallel>, #tpu.dimension_semantics<arbitrary>], iteration_bounds = array<i64: 1, 1>, scalar_prefetch = 0 : i64, scratch_operands = 2 : i64, tpu.core_type = #tpu.core_type<tc>, window_params = [{transform_indices = @transform_0, window_bounds = array<i64: 16, 32>}, {transform_indices = @transform_1, window_bounds = array<i64: 32, 128>}, {transform_indices = @transform_2, window_bounds = array<i64: 1, 128>}, {transform_indices = @transform_3, window_bounds = array<i64: 128, 128>}, {pipeline_mode = #tpu.pipeline_mode<synchronous>, transform_indices = @transform_4, window_bounds = array<i64: 1, 128>}, {transform_indices = @transform_5, window_bounds = array<i64: 16, 128>}]} {
    %c0_i32 = arith.constant 0 : i32
    %0 = arith.cmpi eq, %arg1, %c0_i32 : i32
    %1 = arith.extui %0 : i1 to i32
    %c0_i32_0 = arith.constant 0 : i32
    %2 = arith.cmpi ne, %1, %c0_i32_0 : i32
    scf.if %2 {
      %cst_19 = arith.constant 0.000000e+00 : f32
      %30 = vector.broadcast %cst_19 : f32 to vector<16x128xf32>
      %c0_20 = arith.constant 0 : index
      %c0_21 = arith.constant 0 : index
      %31 = vector.load %arg8[%c0_20, %c0_21] : memref<16x128xf32, #tpu.memory_space<vmem>>, vector<16x128xf32>
      tpu.vector_store %arg8[%c0_20, %c0_21], %30 {strides = array<i32>} : memref<16x128xf32, #tpu.memory_space<vmem>>, vector<16x128xf32>,
      %c0_22 = arith.constant 0 : index
      %c0_23 = arith.constant 0 : index
      %32 = vector.load %arg2[%c0_22, %c0_23] : memref<16x32xf32, #tpu.memory_space<vmem>>, vector<16x32xf32>
      %33 = arith.truncf %32 : vector<16x32xf32> to vector<16x32xbf16>
      %c0_24 = arith.constant 0 : index
      %c0_25 = arith.constant 0 : index
      %34 = vector.load %arg9[%c0_24, %c0_25] : memref<16x32xbf16, #tpu.memory_space<vmem>>, vector<16x32xbf16>
      tpu.vector_store %arg9[%c0_24, %c0_25], %33 {strides = array<i32>} : memref<16x32xbf16, #tpu.memory_space<vmem>>, vector<16x32xbf16>,
    } else {
    }
    %c0 = arith.constant 0 : index
    %c0_1 = arith.constant 0 : index
    %3 = vector.load %arg9[%c0, %c0_1] : memref<16x32xbf16, #tpu.memory_space<vmem>>, vector<16x32xbf16>
    %c0_2 = arith.constant 0 : index
    %c0_3 = arith.constant 0 : index
    %4 = vector.load %arg3[%c0_2, %c0_3] : memref<32x128xbf16, #tpu.memory_space<vmem>>, vector<32x128xbf16>
    %cst = arith.constant dense<0.000000e+00> : vector<16x128xf32>
    %5 = tpu.matmul %3, %4, %cst {dimension_numbers = #tpu.dot_dimension_numbers<[1], [0], [0], [1], [0, 0, 1, 1], [], []>} : vector<16x32xbf16>, vector<32x128xbf16>, vector<16x128xf32> -> vector<16x128xf32>
    %c0_4 = arith.constant 0 : index
    %c0_5 = arith.constant 0 : index
    %6 = vector.load %arg4[%c0_4, %c0_5] : memref<1x128xf32, #tpu.memory_space<vmem>>, vector<1x128xf32>
    %7 = vector.broadcast %6 : vector<1x128xf32> to vector<16x128xf32>
    %8 = arith.addf %5, %7 : vector<16x128xf32>
    %9 = arith.mulf %8, %8 : vector<16x128xf32>
    %cst_6 = arith.constant 0.0356774069 : f32
    %10 = vector.broadcast %cst_6 : f32 to vector<16x128xf32>
    %11 = arith.mulf %10, %9 : vector<16x128xf32>
    %cst_7 = arith.constant 0.797884583 : f32
    %12 = vector.broadcast %cst_7 : f32 to vector<16x128xf32>
    %13 = arith.addf %12, %11 : vector<16x128xf32>
    %14 = arith.mulf %8, %13 : vector<16x128xf32>
    %15 = math.tanh %14 : vector<16x128xf32>
    %cst_8 = arith.constant 5.000000e-01 : f32
    %16 = vector.broadcast %cst_8 : f32 to vector<16x128xf32>
    %17 = arith.mulf %16, %15 : vector<16x128xf32>
    %cst_9 = arith.constant 5.000000e-01 : f32
    %18 = vector.broadcast %cst_9 : f32 to vector<16x128xf32>
    %19 = arith.addf %18, %17 : vector<16x128xf32>
    %20 = arith.mulf %8, %19 : vector<16x128xf32>
    %c0_10 = arith.constant 0 : index
    %c0_11 = arith.constant 0 : index
    %21 = vector.load %arg8[%c0_10, %c0_11] : memref<16x128xf32, #tpu.memory_space<vmem>>, vector<16x128xf32>
    %22 = arith.truncf %20 : vector<16x128xf32> to vector<16x128xbf16>
    %c0_12 = arith.constant 0 : index
    %c0_13 = arith.constant 0 : index
    %23 = vector.load %arg5[%c0_12, %c0_13] : memref<128x128xbf16, #tpu.memory_space<vmem>>, vector<128x128xbf16>
    %cst_14 = arith.constant dense<0.000000e+00> : vector<16x128xf32>
    %24 = tpu.matmul %22, %23, %cst_14 {dimension_numbers = #tpu.dot_dimension_numbers<[1], [0], [0], [1], [0, 0, 1, 1], [], []>} : vector<16x128xbf16>, vector<128x128xbf16>, vector<16x128xf32> -> vector<16x128xf32>
    %25 = arith.addf %21, %24 : vector<16x128xf32>
    %c0_15 = arith.constant 0 : index
    %c0_16 = arith.constant 0 : index
    %26 = vector.load %arg8[%c0_15, %c0_16] : memref<16x128xf32, #tpu.memory_space<vmem>>, vector<16x128xf32>
    tpu.vector_store %arg8[%c0_15, %c0_16], %25 {strides = array<i32>} : memref<16x128xf32, #tpu.memory_space<vmem>>, vector<16x128xf32>,
    %c0_i32_17 = arith.constant 0 : i32
    %27 = arith.cmpi eq, %arg1, %c0_i32_17 : i32
    %28 = arith.extui %27 : i1 to i32
    %c0_i32_18 = arith.constant 0 : i32
    %29 = arith.cmpi ne, %28, %c0_i32_18 : i32
    scf.if %29 {
      %c0_19 = arith.constant 0 : index
      %c0_20 = arith.constant 0 : index
      %30 = vector.load %arg8[%c0_19, %c0_20] : memref<16x128xf32, #tpu.memory_space<vmem>>, vector<16x128xf32>
      %c0_21 = arith.constant 0 : index
      %c0_22 = arith.constant 0 : index
      %31 = vector.load %arg6[%c0_21, %c0_22] : memref<1x128xf32, #tpu.memory_space<vmem>>, vector<1x128xf32>
      %32 = vector.broadcast %31 : vector<1x128xf32> to vector<16x128xf32>
      %33 = arith.addf %30, %32 : vector<16x128xf32>
      %c0_23 = arith.constant 0 : index
      %c0_24 = arith.constant 0 : index
      %34 = vector.load %arg7[%c0_23, %c0_24] : memref<16x128xf32, #tpu.memory_space<vmem>>, vector<16x128xf32>
      tpu.vector_store %arg7[%c0_23, %c0_24], %33 {strides = array<i32>} : memref<16x128xf32, #tpu.memory_space<vmem>>, vector<16x128xf32>,
    } else {
    }
    return
  }
  func.func @transform_0(%arg0: i32, %arg1: i32) -> (i32, i32) {
    %c0_i32 = arith.constant 0 : i32
    %c0_i32_0 = arith.constant 0 : i32
    return %arg0, %c0_i32 : i32, i32
  }
  func.func @transform_1(%arg0: i32, %arg1: i32) -> (i32, i32) {
    %c0_i32 = arith.constant 0 : i32
    %c0_i32_0 = arith.constant 0 : i32
    return %c0_i32, %arg1 : i32, i32
  }
  func.func @transform_2(%arg0: i32, %arg1: i32) -> (i32, i32) {
    %c0_i32 = arith.constant 0 : i32
    %c0_i32_0 = arith.constant 0 : i32
    return %c0_i32, %arg1 : i32, i32
  }
  func.func @transform_3(%arg0: i32, %arg1: i32) -> (i32, i32) {
    %c0_i32 = arith.constant 0 : i32
    %c0_i32_0 = arith.constant 0 : i32
    return %arg1, %c0_i32 : i32, i32
  }
  func.func @transform_4(%arg0: i32, %arg1: i32) -> (i32, i32) {
    %c0_i32 = arith.constant 0 : i32
    %c0_i32_0 = arith.constant 0 : i32
    %c0_i32_1 = arith.constant 0 : i32
    return %c0_i32, %c0_i32_0 : i32, i32
  }
  func.func @transform_5(%arg0: i32, %arg1: i32) -> (i32, i32) {
    %c0_i32 = arith.constant 0 : i32
    %c0_i32_0 = arith.constant 0 : i32
    return %arg0, %c0_i32 : i32, i32
  }
}

</mosaic_0001>

<bundles_post_ra>
// kernel: tpu_custom_call.1
= control target key start
LH: loop header
LB: loop body
LE: loop exit
PB: predicated region body
PF: predicated region fallthrough
CT: control target
= control target key end

     0   :  { %10 = vsyncpa [#allocation5], 0  ;;  %s552_s0 = inlined_call_operand.hbm [shape: f32[16,32], index: 0, kind: input, shape index: {}]   ;;  %s553_s1 = inlined_call_operand.hbm [shape: bf16[32,128], index: 1, kind: input, shape index: {}]   ;;  %s554_s2 = inlined_call_operand.vmem [shape: f32[1,128], index: 2, kind: input, shape index: {}]   ;;  %s555_s3 = inlined_call_operand.hbm [shape: bf16[128,128], index: 3, kind: input, shape index: {}]   ;;  %s556_s4 = inlined_call_operand.vmem [shape: f32[1,128], index: 4, kind: input, shape index: {}]   ;;  %s557_s5 = inlined_call_operand.hbm [shape: f32[16,128], index: 5, kind: output, shape index: {}]  }
   0x1   :  { %11 = vsyncpa [#allocation8], 0 }
   0x2   :  { %12 = vsyncpa [#allocation6], 0  ;;  %s488_s18 = smov [#allocation7]  }
   0x3   :  { %s30_s19 = sshll.u32 %s488_s18, 4  ;;  %s31_s19 = int_to_ptr.vmem [resolvable:$true] %s30_s19 }
   0x4   :  { %s410_s20 = scalar_lea.vmem %s31_s19, 256  ;;  %p415_p1 = scmp.lt.s32.totalorder %s31_s19, %s31_s19 }
   0x5   :  { %p411_p0 = scmp.ne.s32.totalorder %s31_s19, %s410_s20  ;;  %p416_p2 = scmp.lt.s32.totalorder %s410_s20, %s410_s20 }
   0x7   :  { %p417_p3 = por %p416_p2, %p415_p1 }
   0x9   :  { %p418_p4 = pnand %p417_p3, %p411_p0 }
   0xb   :  { %421 = shalt.err (!%p418_p4)
}
   0xc   :  { %s489_s21 = smov 64   ;;  %s490_s22 = smov 4  }
   0xd   :  { %36 = dma.hbm_to_vmem [thread:$0]  %s553_s1, 256, %s31_s19, [#allocation8], %s489_s21, %s489_s21, %s490_s22  }
   0xe   :  { %s491_s25 = smov [#allocation4]  }
   0xf   :  { %s18_s26 = sshll.u32 %s491_s25, 4  ;;  %s19_s26 = int_to_ptr.vmem [resolvable:$true] %s18_s26 }
  0x10   :  { %s430_s27 = scalar_lea.vmem %s19_s26, 256  ;;  %p435_p6 = scmp.lt.s32.totalorder %s19_s26, %s19_s26 }
  0x11   :  { %p431_p5 = scmp.ne.s32.totalorder %s19_s26, %s430_s27  ;;  %p436_p7 = scmp.lt.s32.totalorder %s430_s27, %s430_s27 }
  0x13   :  { %p437_p8 = por %p436_p7, %p435_p6 }
  0x15   :  { %p438_p9 = pnand %p437_p8, %p431_p5 }
  0x17   :  { %441 = shalt.err (!%p438_p9)
}
  0x18   :  { %s492_s28 = smov 128   ;;  %s493_s29 = smov 8  }
  0x19   :  { %24 = dma.hbm_to_vmem [thread:$0]  %s552_s0, 256, %s19_s26, [#allocation5], %s492_s28, %s492_s28, %s493_s29  }
  0x1a   :  { %s494_s1 = smov [#allocation9]  }
  0x1b   :  { %s44_s7 = sshll.u32 %s494_s1, 4  ;;  %s45_s7 = int_to_ptr.vmem [resolvable:$true] %s44_s7 }
  0x1c   :  { %s450_s8 = scalar_lea.vmem %s45_s7, 1024  ;;  %p455_p11 = scmp.lt.s32.totalorder %s45_s7, %s45_s7 }
  0x1d   :  { %p451_p10 = scmp.ne.s32.totalorder %s45_s7, %s450_s8  ;;  %p456_p12 = scmp.lt.s32.totalorder %s450_s8, %s450_s8 }
  0x1f   :  { %p457_p13 = por %p456_p12, %p455_p11 }
  0x21   :  { %p458_p0 = pnand %p457_p13, %p451_p10 }
  0x23   :  { %461 = shalt.err (!%p458_p0)
}
  0x24   :  { %50 = dma.hbm_to_vmem [thread:$0]  %s555_s3, 1024, %s45_s7, [#allocation8], %s489_s21, %s489_s21, %s490_s22  }
  0x25   :  { %482 = dma.done.wait [#allocation5], 256  }
  0x26   :  { %483 = vsyncadd [#allocation5], 4294967040 }
  0x27   :  { %484 = dma.done.wait [#allocation8], 1280  }
  0x28   :  { %485 = vsyncadd [#allocation8], 4294966016  ;;  %v495_v0 = vmov 0.0   ;;  %vm496_vm0 = vmmov 0   ;;  %v387_v1 = vld [vmem:[#allocation7 + $0x8] sm:$0xff]   ;;  %v388_v2 = vld [vmem:[#allocation7] sm:$0xff]  }
  0x29   :  { %349 = vmatprep.subr.bf16.mxu0 %v495_v0  ;;  %353 = vmatprep.mubr.msk.bf16.mxu0 %vm496_vm0, %v495_v0  ;;  %v69_v3 = vld [vmem:[#allocation4] sm:$0xff]  ;;  %v70_v4 = vld [vmem:[#allocation4 + $0x8] sm:$0xff]  ;;  %vm79_vm1 = vcmask 257024   ;;  %vm112_vm2 = vcmask 261120   ;;  %v390_v8 = vld [vmem:[#allocation9 + $0x38] sm:$0xff]   ;;  %s497_s12 = smov [#allocation10]  }
  0x2a   :  { %357 = vmatprep.subr.bf16.mxu1 %v495_v0  ;;  %373 = vmatprep.mubr.msk.bf16.mxu1 %vm496_vm0, %v495_v0  ;;  %v335_v5 = vpack.c.bf16 %v69_v3, %v69_v3  ;;  %v336_v6 = vpack.c.bf16 %v70_v4, %v70_v4  ;;  %v391_v9 = vld [vmem:[#allocation9 + $0x30] sm:$0xff]   ;;  %v392_v10 = vld [vmem:[#allocation9 + $0x28] sm:$0xff]   ;;  %v393_v11 = vld [vmem:[#allocation9 + $0x20] sm:$0xff]   ;;  %s306_s13 = sshll.u32 %s497_s12, 4  ;;  %s307_s13 = int_to_ptr.vmem [resolvable:$true] %s306_s13 }
  0x2b   :  { %350 = vmatpush3.bf16.msra.mxu0 %v387_v1  ;;  %358 = vmatpush3.bf16.msra.mxu1 %v390_v8  ;;  %v394_v12 = vld [vmem:[#allocation9 + $0x18] sm:$0xff]   ;;  %v395_v13 = vld [vmem:[#allocation9 + $0x10] sm:$0xff]   ;;  %v396_v14 = vld [vmem:[#allocation9 + $0x8] sm:$0xff]   ;;  %s462_s14 = scalar_lea.vmem %s307_s13, 256  ;;  %p467_p2 = scmp.lt.s32.totalorder %s307_s13, %s307_s13 }
  0x2c   :  { %351 = vmatprep.subr.bf16.mxu0 %v495_v0  ;;  %80 = vst.msk [vmem:[#allocation3] sm:$0xf] %vm79_vm1, %v335_v5  ;;  %81 = vst.msk [vmem:[#allocation3 + $0x4] sm:$0xf] %vm79_vm1, %v336_v6  ;;  %359 = vmatprep.subr.bf16.mxu1 %v495_v0  ;;  %v397_v15 = vld [vmem:[#allocation9] sm:$0xff]   ;;  %p463_p1 = scmp.ne.s32.totalorder %s307_s13, %s462_s14  ;;  %p468_p3 = scmp.lt.s32.totalorder %s462_s14, %s462_s14 }
  0x2d   :  { %v321_v16 = vld [vmem:[%s554_s2] ss:$0 sm:$0xff] }
  0x2e   :  { %v334_v40 = vld [vmem:[%s556_s4] ss:$0 sm:$0xff]  ;;  %p469_p4 = por %p468_p3, %p467_p2 }
  0x2f   :  { %352 = vmatpush3.bf16.msra.mxu0 %v388_v2  ;;  %360 = vmatpush3.bf16.msra.mxu1 %v391_v9 }
  0x30   :  { %361 = vmatprep.subr.bf16.mxu1 %v495_v0  ;;  %p470_p5 = pnand %p469_p4, %p463_p1 }
  0x33   :  { %v389_v7 = vld [vmem:[#allocation3] sm:$0xff]   ;;  %362 = vmatpush3.bf16.msra.mxu1 %v392_v10 }
  0x34   :  { %354 = vmatmul.mubr.msk.bf16.vlgmr.msra.gmra.mxu0 %vm112_vm2, %v389_v7  ;;  %363 = vmatprep.subr.bf16.mxu1 %v495_v0 }
  0x37   :  { %364 = vmatpush3.bf16.msra.mxu1 %v393_v11 }
  0x38   :  { %365 = vmatprep.subr.bf16.mxu1 %v495_v0 }
  0x3b   :  { %366 = vmatpush3.bf16.msra.mxu1 %v394_v12 }
  0x3c   :  { %367 = vmatprep.subr.bf16.mxu1 %v495_v0 }
  0x3f   :  { %368 = vmatpush3.bf16.msra.mxu1 %v395_v13 }
  0x40   :  { %369 = vmatprep.subr.bf16.mxu1 %v495_v0 }
  0x43   :  { %370 = vmatpush3.bf16.msra.mxu1 %v396_v14 }
  0x44   :  { %371 = vmatprep.subr.bf16.mxu1 %v495_v0 }
  0x47   :  { %372 = vmatpush3.bf16.msra.mxu1 %v397_v15 }
  0xf4   :  { %v150_v17 = vpop.f32.mrf.mxu0 }
  0xf5   :  { %v151_v18 = vadd.f32 %v321_v16, %v150_v17 }
  0xf6   :  { %v355_v19 = vpop.f32.mrf.mxu0 }
  0xf7   :  { %v157_v20 = vmul.f32 %v151_v18, %v151_v18 }
  0xf8   :  { %v153_v21 = vpop.f32.mrf.mxu0 }
  0xf9   :  { %v159_v22 = vmul.f32 0.035677407, %v157_v20  ;;  %v154_v23 = vadd.f32 %v321_v16, %v153_v21 }
  0xfa   :  { %v356_v24 = vpop.f32.mrf.mxu0 }
  0xfb   :  { %v161_v25 = vadd.f32 0.7978846, %v159_v22  ;;  %v158_v26 = vmul.f32 %v154_v23, %v154_v23 }
  0xfd   :  { %v163_v27 = vmul.f32 %v161_v25, %v151_v18  ;;  %v160_v28 = vmul.f32 0.035677407, %v158_v26 }
  0xff   :  { %398 = vtanh.f32 %v163_v27  ;;  %v162_v29 = vadd.f32 0.7978846, %v160_v28 }
 0x101   :  { %v164_v30 = vmul.f32 %v162_v29, %v154_v23 }
 0x103   :  { %400 = vtanh.f32 %v164_v30 }
 0x10c   :  { %v399_v31 = vpop.eup %398 }
 0x10d   :  { %v167_v32 = vmul.f32 0.5, %v399_v31 }
 0x10f   :  { %v169_v34 = vadd.f32 0.5, %v167_v32 }
 0x110   :  { %v401_v33 = vpop.eup %400 }
 0x111   :  { %v168_v35 = vmul.f32 0.5, %v401_v33  ;;  %v171_v37 = vmul.f32 %v169_v34, %v151_v18 }
 0x113   :  { %v170_v36 = vadd.f32 0.5, %v168_v35 }
 0x115   :  { %v172_v38 = vmul.f32 %v170_v36, %v154_v23 }
 0x117   :  { %v175_v39 = vpack.c.bf16 %v172_v38, %v171_v37 }
 0x119   :  { %374 = vmatmul.mubr.bf16.vlgmr.msra.gmra.mxu1 %v175_v39 }
 0x1d9   :  { %v274_v41 = vpop.f32.mrf.mxu1 }
 0x1da   :  { %v297_v42 = vadd.f32 %v334_v40, %v274_v41 }
 0x1db   :  { %v375_v43 = vpop.f32.mrf.mxu1 }
 0x1dc   :  { %299 = vst [vmem:[#allocation10] sm:$0xff] %v297_v42 }
 0x1dd   :  { %v277_v44 = vpop.f32.mrf.mxu1 }
 0x1de   :  { %v298_v45 = vadd.f32 %v334_v40, %v277_v44 }
 0x1df   :  { %v376_v46 = vpop.f32.mrf.mxu1 }
 0x1e0   :  { %300 = vst [vmem:[#allocation10 + $0x8] sm:$0xff] %v298_v45 }
 0x1e1   :  { %473 = shalt.err (!%p470_p5)
}
 0x1e2   :  { %312 = dma.vmem_to_hbm [thread:$0]  %s307_s13, 256, %s557_s5, [#allocation6], %s492_s28, %s492_s28, %s493_s29  }
 0x1e3   :  { %486 = dma.done.wait [#allocation6], 256  }
 0x1e4   :  { %487 = vsyncadd [#allocation6], 4294967040 }
 0x1e5   :  { %316 = vsyncpa [#allocation5], 1 }
 0x1e6   :  { %317 = vsyncpa [#allocation8], 1 }
 0x1e7   :  { %318 = vsyncpa [#allocation6], 1 }

</bundles_post_ra>
